<compile_context>
chip_gen: v6e
topology: v6e:2x2x1
jax: 0.10.0
libtpu: 0.0.40
codegen_flags: <defaults>
</compile_context>

<pallas_src>
import functools

import jax
import jax.numpy as jnp
from jax import lax
from jax.experimental import pallas as pl
from jax.experimental.pallas import tpu as pltpu

_LANE = 128


def _round_up(a, b):
    return (a + b - 1) // b * b


def _k_tiling(feat, block_k):
    tk = min(block_k, _round_up(feat, _LANE))
    return tk, _round_up(feat, tk)


def pack_ensemble_weights(weights, biases, *, block_k=512):
    """Fuse per-model linear heads into one lane-dense bf16 matrix.

    Call ONCE at model init (not per forward): returns
      w_fused: (F_pad, N_pad) bf16, model m's classes at columns
               [m*NCLS, (m+1)*NCLS); class axis zero-padded to a 128 multiple,
               feature axis zero-padded to a multiple of the K tile.
      b_fused: (1, N_pad) f32.
    """
    num_models, feat, ncls = weights.shape
    n = num_models * ncls
    n_pad = _round_up(n, _LANE)
    _, f_pad = _k_tiling(feat, block_k)

    w = jnp.transpose(weights.astype(jnp.float32), (1, 0, 2)).reshape(feat, n)
    w = jnp.pad(w, ((0, f_pad - feat), (0, n_pad - n))).astype(jnp.bfloat16)
    b = jnp.pad(biases.astype(jnp.float32).reshape(1, n), ((0, 0), (0, n_pad - n)))
    return w, b


def _ensemble_kernel(x_ref, w_ref, b_ref, o_ref, acc_ref, *, num_models, num_classes):
    k = pl.program_id(1)

    @pl.when(k == 0)
    def _():
        # Fold the bias into the accumulator init.
        acc_ref[...] = jnp.broadcast_to(b_ref[...], acc_ref.shape)

    # K-tiled fused matmul for all models: (tr, tk) @ (tk, N_pad), f32 acc.
    acc_ref[...] += jnp.dot(x_ref[...], w_ref[...],
                            preferred_element_type=jnp.float32)

    @pl.when(k == pl.num_programs(1) - 1)
    def _():
        logits = acc_ref[...]
        rows, n_pad = logits.shape
        lane = lax.broadcasted_iota(jnp.int32, (rows, n_pad), 1)
        neg_big = jnp.float32(-1e30)

        # Per-model masked softmax (classes packed contiguously along lanes).
        probs = jnp.zeros_like(logits)
        for m in range(num_models):                      # static unroll; M tiny
            lo = m * num_classes
            in_seg = (lane >= lo) & (lane < lo + num_classes)
            lg = jnp.where(in_seg, logits, neg_big)
            mx = jnp.max(lg, axis=1, keepdims=True)
            e = jnp.where(in_seg, jnp.exp(lg - mx), 0.0)
            denom = jnp.sum(e, axis=1, keepdims=True)
            probs = probs + e * pl.reciprocal(denom, approx=True)

        # torch.mean(out, dim=0): fold each model's segment back onto class
        # lanes [0, NCLS) with a tiny exact combine matmul (entries 0 or 1/M).
        l_idx = lax.broadcasted_iota(jnp.int32, (n_pad, n_pad), 0)
        c_idx = lax.broadcasted_iota(jnp.int32, (n_pad, n_pad), 1)
        inv_m = jnp.float32(1.0 / num_models)
        comb = jnp.zeros((n_pad, n_pad), jnp.float32)
        for m in range(num_models):
            hit = (l_idx == c_idx + m * num_classes) & (c_idx < num_classes)
            comb = comb + jnp.where(hit, inv_m, jnp.float32(0.0))
        o_ref[...] = jnp.dot(probs, comb, preferred_element_type=jnp.float32)


def ensemble_net_pallas(x_nchw, w_fused, b_fused, *, num_models, num_classes,
                        aug_ensemble=False, block_k=512, block_rows=256):
    """Ensemble forward. `w_fused`/`b_fused` come from pack_ensemble_weights."""
    batch = x_nchw.shape[0]
    feat = 1
    for d in x_nchw.shape[1:]:
        feat *= int(d)

    tk, f_pad = _k_tiling(feat, block_k)
    f_w, n_pad = w_fused.shape
    assert f_w == f_pad, "w_fused was packed with a different block_k"
    assert n_pad % _LANE == 0 and num_models * num_classes <= n_pad
    assert b_fused.shape == (1, n_pad)

    if aug_ensemble:
        # mean(x @ W + b, dim=0) == mean(x, dim=0) @ W + b  (exact by linearity)
        x_in = jnp.mean(x_nchw.reshape(batch, feat).astype(jnp.float32),
                        axis=0, keepdims=True).astype(jnp.bfloat16)
    else:
        # No f32 round-trip: reshape + a single cast to bf16.
        x_in = x_nchw.reshape(batch, feat).astype(jnp.bfloat16)
    rows = x_in.shape[0]

    # Row tiling ("parallel" axis: both v7x TensorCores get work at large B).
    if rows <= block_rows:
        tr, rows_pad = rows, rows
    else:
        tr = block_rows
        rows_pad = _round_up(rows, tr)
    pad_r, pad_f = rows_pad - rows, f_pad - feat
    if pad_r or pad_f:
        x_in = jnp.pad(x_in, ((0, pad_r), (0, pad_f)))

    grid = (rows_pad // tr, f_pad // tk)

    # Explicit VMEM budget: double-buffered inputs + output + f32 accumulator
    # plus headroom; floor at the smallest (v5e) scoped default.
    vmem_bytes = (2 * (tr * tk * 2 + tk * n_pad * 2 + n_pad * 4 + tr * n_pad * 4)
                  + tr * n_pad * 4 + (2 << 20))
    vmem_limit = int(max(vmem_bytes, 16 << 20))

    kernel = functools.partial(_ensemble_kernel, num_models=num_models,
                               num_classes=num_classes)

    out_pad = pl.pallas_call(
        kernel,
        out_shape=jax.ShapeDtypeStruct((rows_pad, n_pad), jnp.float32),
        grid_spec=pltpu.PrefetchScalarGridSpec(
            num_scalar_prefetch=0,
            grid=grid,
            in_specs=[
                pl.BlockSpec((tr, tk), lambda r, k: (r, k)),        # activations
                pl.BlockSpec((tk, n_pad), lambda r, k: (k, 0)),     # fused weights
                pl.BlockSpec((1, n_pad), lambda r, k: (0, 0)),      # fused biases
            ],
            out_specs=pl.BlockSpec((tr, n_pad), lambda r, k: (r, 0)),
            scratch_shapes=[pltpu.VMEM((tr, n_pad), jnp.float32)],
        ),
        compiler_params=pltpu.CompilerParams(
            dimension_semantics=("parallel", "arbitrary"),
            vmem_limit_bytes=vmem_limit,
        ),
    )(x_in, w_fused, b_fused)

    out = out_pad[:rows, :num_classes]
    if aug_ensemble:
        out = out[0]          # PyTorch aug path returns shape (NCLS,)
    return out


def ensemble_net_ref(x_nchw, weights, biases, *, aug_ensemble=False):
    """Pure-JAX (f32) reference mirroring the PyTorch forward."""
    batch = x_nchw.shape[0]
    x_flat = x_nchw.reshape(batch, -1).astype(jnp.float32)
    outs = []
    for m in range(weights.shape[0]):
        logits = x_flat @ weights[m] + biases[m]
        if aug_ensemble:
            logits = jnp.mean(logits, axis=0, keepdims=True)
        outs.append(jax.nn.softmax(logits, axis=1))
    out = jnp.mean(jnp.stack(outs, axis=0), axis=0)
    if aug_ensemble:
        out = out[0]
    return out


if __name__ == "__main__":
    key = jax.random.PRNGKey(0)
    B, C, H, W = 2, 4, 16, 16
    NUM_MODELS, NCLS = 3, 10
    F = C * H * W

    kx, kw, kb = jax.random.split(key, 3)
    x = jax.random.normal(kx, (B, C, H, W), dtype=jnp.float32)
    weights = 0.05 * jax.random.normal(kw, (NUM_MODELS, F, NCLS), dtype=jnp.float32)
    biases = 0.01 * jax.random.normal(kb, (NUM_MODELS, NCLS), dtype=jnp.float32)

    # Fused weights are packed ONCE at init, not per forward call.
    BLOCK_K = 512  # F=1024 -> 2 pipelined K steps (exercises the accumulator)
    w_fused, b_fused = jax.block_until_ready(
        pack_ensemble_weights(weights, biases, block_k=BLOCK_K))

    ok = True
    for aug in (False, True):
        out = jax.block_until_ready(
            ensemble_net_pallas(x, w_fused, b_fused,
                                num_models=NUM_MODELS, num_classes=NCLS,
                                aug_ensemble=aug, block_k=BLOCK_K))
        ref = ensemble_net_ref(x, weights, biases, aug_ensemble=aug)
        # bf16 inputs / f32 accumulation / approx reciprocal -> loose tolerance
        if out.shape != ref.shape or not jnp.allclose(out, ref, atol=2e-2, rtol=2e-2):
            ok = False
            print("MISMATCH aug_ensemble=", aug, out.shape, ref.shape,
                  float(jnp.max(jnp.abs(out - ref))))

    if ok:
        print("KERNEL_OK")
</pallas_src>

<mosaic_0001>
module attributes {stable_mosaic.version = 11 : i64} {
  func.func @_ensemble_kernel(%arg0: i32, %arg1: i32, %arg2: memref<2x512xbf16, #tpu.memory_space<vmem>>, %arg3: memref<512x128xbf16, #tpu.memory_space<vmem>>, %arg4: memref<1x128xf32, #tpu.memory_space<vmem>>, %arg5: memref<2x128xf32, #tpu.memory_space<vmem>>, %arg6: memref<2x128xf32, #tpu.memory_space<vmem>>) attributes {dimension_semantics = [#tpu.dimension_semantics<parallel>, #tpu.dimension_semantics<arbitrary>], iteration_bounds = array<i64: 1, 2>, scalar_prefetch = 0 : i64, scratch_operands = 1 : i64, tpu.core_type = #tpu.core_type<tc>, window_params = [{transform_indices = @transform_0, window_bounds = array<i64: 2, 512>}, {transform_indices = @transform_1, window_bounds = array<i64: 512, 128>}, {pipeline_mode = #tpu.pipeline_mode<synchronous>, transform_indices = @transform_2, window_bounds = array<i64: 1, 128>}, {transform_indices = @transform_3, window_bounds = array<i64: 2, 128>}]} {
    %c0_i32 = arith.constant 0 : i32
    %0 = arith.cmpi eq, %arg1, %c0_i32 : i32
    %1 = arith.extui %0 : i1 to i32
    %c0_i32_0 = arith.constant 0 : i32
    %2 = arith.cmpi ne, %1, %c0_i32_0 : i32
    scf.if %2 {
      %c0_9 = arith.constant 0 : index
      %c0_10 = arith.constant 0 : index
      %12 = vector.load %arg4[%c0_9, %c0_10] : memref<1x128xf32, #tpu.memory_space<vmem>>, vector<1x128xf32>
      %13 = vector.shape_cast %12 : vector<1x128xf32> to vector<1x128xf32>
      %14 = vector.broadcast %13 : vector<1x128xf32> to vector<2x128xf32>
      %c0_11 = arith.constant 0 : index
      %c0_12 = arith.constant 0 : index
      %15 = vector.load %arg6[%c0_11, %c0_12] : memref<2x128xf32, #tpu.memory_space<vmem>>, vector<2x128xf32>
      tpu.vector_store %arg6[%c0_11, %c0_12], %14 {strides = array<i32>} : memref<2x128xf32, #tpu.memory_space<vmem>>, vector<2x128xf32>,
    } else {
    }
    %c0 = arith.constant 0 : index
    %c0_1 = arith.constant 0 : index
    %3 = vector.load %arg6[%c0, %c0_1] : memref<2x128xf32, #tpu.memory_space<vmem>>, vector<2x128xf32>
    %c0_2 = arith.constant 0 : index
    %c0_3 = arith.constant 0 : index
    %4 = vector.load %arg2[%c0_2, %c0_3] : memref<2x512xbf16, #tpu.memory_space<vmem>>, vector<2x512xbf16>
    %c0_4 = arith.constant 0 : index
    %c0_5 = arith.constant 0 : index
    %5 = vector.load %arg3[%c0_4, %c0_5] : memref<512x128xbf16, #tpu.memory_space<vmem>>, vector<512x128xbf16>
    %cst = arith.constant dense<0.000000e+00> : vector<2x128xf32>
    %6 = tpu.matmul %4, %5, %cst {dimension_numbers = #tpu.dot_dimension_numbers<[1], [0], [0], [1], [0, 0, 1, 1], [], []>} : vector<2x512xbf16>, vector<512x128xbf16>, vector<2x128xf32> -> vector<2x128xf32>
    %7 = arith.addf %3, %6 : vector<2x128xf32>
    %c0_6 = arith.constant 0 : index
    %c0_7 = arith.constant 0 : index
    %8 = vector.load %arg6[%c0_6, %c0_7] : memref<2x128xf32, #tpu.memory_space<vmem>>, vector<2x128xf32>
    tpu.vector_store %arg6[%c0_6, %c0_7], %7 {strides = array<i32>} : memref<2x128xf32, #tpu.memory_space<vmem>>, vector<2x128xf32>,
    %c1_i32 = arith.constant 1 : i32
    %9 = arith.cmpi eq, %arg1, %c1_i32 : i32
    %10 = arith.extui %9 : i1 to i32
    %c0_i32_8 = arith.constant 0 : i32
    %11 = arith.cmpi ne, %10, %c0_i32_8 : i32
    scf.if %11 {
      %c0_9 = arith.constant 0 : index
      %c0_10 = arith.constant 0 : index
      %12 = vector.load %arg6[%c0_9, %c0_10] : memref<2x128xf32, #tpu.memory_space<vmem>>, vector<2x128xf32>
      %13 = tpu.iota {dimensions = array<i32: 1>} : vector<2x128xi32>
      %cst_11 = arith.constant 0.000000e+00 : f32
      %14 = vector.broadcast %cst_11 : f32 to vector<2x128xf32>
      %c0_i32_12 = arith.constant 0 : i32
      %15 = vector.broadcast %c0_i32_12 : i32 to vector<2x128xi32>
      %16 = arith.cmpi sge, %13, %15 : vector<2x128xi32>
      %c10_i32 = arith.constant 10 : i32
      %17 = vector.broadcast %c10_i32 : i32 to vector<2x128xi32>
      %18 = arith.cmpi slt, %13, %17 : vector<2x128xi32>
      %19 = arith.andi %16, %18 : vector<2x128xi1>
      %cst_13 = arith.constant -1.000000e+30 : f32
      %20 = vector.broadcast %cst_13 : f32 to vector<2x128xf32>
      %21 = arith.select %19, %12, %20 : vector<2x128xi1>, vector<2x128xf32>
      %cst_14 = arith.constant dense<0xFF800000> : vector<2xf32>
      %22 = vector.multi_reduction <maximumf>, %21, %cst_14 [1] : vector<2x128xf32> to vector<2xf32>
      %23 = vector.shape_cast %22 : vector<2xf32> to vector<2x1xf32>
      %24 = vector.broadcast %23 : vector<2x1xf32> to vector<2x128xf32>
      %25 = arith.subf %21, %24 : vector<2x128xf32>
      %26 = math.exp %25 : vector<2x128xf32>
      %cst_15 = arith.constant 0.000000e+00 : f32
      %27 = vector.broadcast %cst_15 : f32 to vector<2x128xf32>
      %28 = arith.select %19, %26, %27 : vector<2x128xi1>, vector<2x128xf32>
      %cst_16 = arith.constant dense<0.000000e+00> : vector<2xf32>
      %29 = vector.multi_reduction <add>, %28, %cst_16 [1] : vector<2x128xf32> to vector<2xf32>
      %30 = vector.shape_cast %29 : vector<2xf32> to vector<2x1xf32>
      %31 = tpu.reciprocal %30 {approx = true} : vector<2x1xf32> -> vector<2x1xf32>
      %32 = vector.broadcast %31 : vector<2x1xf32> to vector<2x128xf32>
      %33 = arith.mulf %28, %32 : vector<2x128xf32>
      %34 = arith.addf %14, %33 : vector<2x128xf32>
      %c10_i32_17 = arith.constant 10 : i32
      %35 = vector.broadcast %c10_i32_17 : i32 to vector<2x128xi32>
      %36 = arith.cmpi sge, %13, %35 : vector<2x128xi32>
      %c20_i32 = arith.constant 20 : i32
      %37 = vector.broadcast %c20_i32 : i32 to vector<2x128xi32>
      %38 = arith.cmpi slt, %13, %37 : vector<2x128xi32>
      %39 = arith.andi %36, %38 : vector<2x128xi1>
      %cst_18 = arith.constant -1.000000e+30 : f32
      %40 = vector.broadcast %cst_18 : f32 to vector<2x128xf32>
      %41 = arith.select %39, %12, %40 : vector<2x128xi1>, vector<2x128xf32>
      %cst_19 = arith.constant dense<0xFF800000> : vector<2xf32>
      %42 = vector.multi_reduction <maximumf>, %41, %cst_19 [1] : vector<2x128xf32> to vector<2xf32>
      %43 = vector.shape_cast %42 : vector<2xf32> to vector<2x1xf32>
      %44 = vector.broadcast %43 : vector<2x1xf32> to vector<2x128xf32>
      %45 = arith.subf %41, %44 : vector<2x128xf32>
      %46 = math.exp %45 : vector<2x128xf32>
      %cst_20 = arith.constant 0.000000e+00 : f32
      %47 = vector.broadcast %cst_20 : f32 to vector<2x128xf32>
      %48 = arith.select %39, %46, %47 : vector<2x128xi1>, vector<2x128xf32>
      %cst_21 = arith.constant dense<0.000000e+00> : vector<2xf32>
      %49 = vector.multi_reduction <add>, %48, %cst_21 [1] : vector<2x128xf32> to vector<2xf32>
      %50 = vector.shape_cast %49 : vector<2xf32> to vector<2x1xf32>
      %51 = tpu.reciprocal %50 {approx = true} : vector<2x1xf32> -> vector<2x1xf32>
      %52 = vector.broadcast %51 : vector<2x1xf32> to vector<2x128xf32>
      %53 = arith.mulf %48, %52 : vector<2x128xf32>
      %54 = arith.addf %34, %53 : vector<2x128xf32>
      %c20_i32_22 = arith.constant 20 : i32
      %55 = vector.broadcast %c20_i32_22 : i32 to vector<2x128xi32>
      %56 = arith.cmpi sge, %13, %55 : vector<2x128xi32>
      %c30_i32 = arith.constant 30 : i32
      %57 = vector.broadcast %c30_i32 : i32 to vector<2x128xi32>
      %58 = arith.cmpi slt, %13, %57 : vector<2x128xi32>
      %59 = arith.andi %56, %58 : vector<2x128xi1>
      %cst_23 = arith.constant -1.000000e+30 : f32
      %60 = vector.broadcast %cst_23 : f32 to vector<2x128xf32>
      %61 = arith.select %59, %12, %60 : vector<2x128xi1>, vector<2x128xf32>
      %cst_24 = arith.constant dense<0xFF800000> : vector<2xf32>
      %62 = vector.multi_reduction <maximumf>, %61, %cst_24 [1] : vector<2x128xf32> to vector<2xf32>
      %63 = vector.shape_cast %62 : vector<2xf32> to vector<2x1xf32>
      %64 = vector.broadcast %63 : vector<2x1xf32> to vector<2x128xf32>
      %65 = arith.subf %61, %64 : vector<2x128xf32>
      %66 = math.exp %65 : vector<2x128xf32>
      %cst_25 = arith.constant 0.000000e+00 : f32
      %67 = vector.broadcast %cst_25 : f32 to vector<2x128xf32>
      %68 = arith.select %59, %66, %67 : vector<2x128xi1>, vector<2x128xf32>
      %cst_26 = arith.constant dense<0.000000e+00> : vector<2xf32>
      %69 = vector.multi_reduction <add>, %68, %cst_26 [1] : vector<2x128xf32> to vector<2xf32>
      %70 = vector.shape_cast %69 : vector<2xf32> to vector<2x1xf32>
      %71 = tpu.reciprocal %70 {approx = true} : vector<2x1xf32> -> vector<2x1xf32>
      %72 = vector.broadcast %71 : vector<2x1xf32> to vector<2x128xf32>
      %73 = arith.mulf %68, %72 : vector<2x128xf32>
      %74 = arith.addf %54, %73 : vector<2x128xf32>
      %75 = tpu.iota {dimensions = array<i32: 0>} : vector<128x128xi32>
      %76 = tpu.iota {dimensions = array<i32: 1>} : vector<128x128xi32>
      %cst_27 = arith.constant 0.000000e+00 : f32
      %77 = vector.broadcast %cst_27 : f32 to vector<128x128xf32>
      %c0_i32_28 = arith.constant 0 : i32
      %78 = vector.broadcast %c0_i32_28 : i32 to vector<128x128xi32>
      %79 = arith.addi %76, %78 : vector<128x128xi32>
      %80 = arith.cmpi eq, %75, %79 : vector<128x128xi32>
      %c10_i32_29 = arith.constant 10 : i32
      %81 = vector.broadcast %c10_i32_29 : i32 to vector<128x128xi32>
      %82 = arith.cmpi slt, %76, %81 : vector<128x128xi32>
      %83 = arith.andi %80, %82 : vector<128x128xi1>
      %cst_30 = arith.constant 0.333333343 : f32
      %cst_31 = arith.constant 0.000000e+00 : f32
      %84 = vector.broadcast %cst_30 : f32 to vector<128x128xf32>
      %85 = vector.broadcast %cst_31 : f32 to vector<128x128xf32>
      %86 = arith.select %83, %84, %85 : vector<128x128xi1>, vector<128x128xf32>
      %87 = arith.addf %77, %86 : vector<128x128xf32>
      %c10_i32_32 = arith.constant 10 : i32
      %88 = vector.broadcast %c10_i32_32 : i32 to vector<128x128xi32>
      %89 = arith.addi %76, %88 : vector<128x128xi32>
      %90 = arith.cmpi eq, %75, %89 : vector<128x128xi32>
      %c10_i32_33 = arith.constant 10 : i32
      %91 = vector.broadcast %c10_i32_33 : i32 to vector<128x128xi32>
      %92 = arith.cmpi slt, %76, %91 : vector<128x128xi32>
      %93 = arith.andi %90, %92 : vector<128x128xi1>
      %cst_34 = arith.constant 0.333333343 : f32
      %cst_35 = arith.constant 0.000000e+00 : f32
      %94 = vector.broadcast %cst_34 : f32 to vector<128x128xf32>
      %95 = vector.broadcast %cst_35 : f32 to vector<128x128xf32>
      %96 = arith.select %93, %94, %95 : vector<128x128xi1>, vector<128x128xf32>
      %97 = arith.addf %87, %96 : vector<128x128xf32>
      %c20_i32_36 = arith.constant 20 : i32
      %98 = vector.broadcast %c20_i32_36 : i32 to vector<128x128xi32>
      %99 = arith.addi %76, %98 : vector<128x128xi32>
      %100 = arith.cmpi eq, %75, %99 : vector<128x128xi32>
      %c10_i32_37 = arith.constant 10 : i32
      %101 = vector.broadcast %c10_i32_37 : i32 to vector<128x128xi32>
      %102 = arith.cmpi slt, %76, %101 : vector<128x128xi32>
      %103 = arith.andi %100, %102 : vector<128x128xi1>
      %cst_38 = arith.constant 0.333333343 : f32
      %cst_39 = arith.constant 0.000000e+00 : f32
      %104 = vector.broadcast %cst_38 : f32 to vector<128x128xf32>
      %105 = vector.broadcast %cst_39 : f32 to vector<128x128xf32>
      %106 = arith.select %103, %104, %105 : vector<128x128xi1>, vector<128x128xf32>
      %107 = arith.addf %97, %106 : vector<128x128xf32>
      %cst_40 = arith.constant dense<0.000000e+00> : vector<2x128xf32>
      %108 = tpu.matmul %74, %107, %cst_40 {dimension_numbers = #tpu.dot_dimension_numbers<[1], [0], [0], [1], [0, 0, 1, 1], [], []>} : vector<2x128xf32>, vector<128x128xf32>, vector<2x128xf32> -> vector<2x128xf32>
      %c0_41 = arith.constant 0 : index
      %c0_42 = arith.constant 0 : index
      %109 = vector.load %arg5[%c0_41, %c0_42] : memref<2x128xf32, #tpu.memory_space<vmem>>, vector<2x128xf32>
      tpu.vector_store %arg5[%c0_41, %c0_42], %108 {strides = array<i32>} : memref<2x128xf32, #tpu.memory_space<vmem>>, vector<2x128xf32>,
    } else {
    }
    return
  }
  func.func @transform_0(%arg0: i32, %arg1: i32) -> (i32, i32) {
    %c0_i32 = arith.constant 0 : i32
    return %arg0, %arg1 : i32, i32
  }
  func.func @transform_1(%arg0: i32, %arg1: i32) -> (i32, i32) {
    %c0_i32 = arith.constant 0 : i32
    %c0_i32_0 = arith.constant 0 : i32
    return %arg1, %c0_i32 : i32, i32
  }
  func.func @transform_2(%arg0: i32, %arg1: i32) -> (i32, i32) {
    %c0_i32 = arith.constant 0 : i32
    %c0_i32_0 = arith.constant 0 : i32
    %c0_i32_1 = arith.constant 0 : i32
    return %c0_i32, %c0_i32_0 : i32, i32
  }
  func.func @transform_3(%arg0: i32, %arg1: i32) -> (i32, i32) {
    %c0_i32 = arith.constant 0 : i32
    %c0_i32_0 = arith.constant 0 : i32
    return %arg0, %c0_i32 : i32, i32
  }
}

</mosaic_0001>

<bundles_post_ra>
// kernel: tpu_custom_call.1
= control target key start
LH: loop header
LB: loop body
LE: loop exit
PB: predicated region body
PF: predicated region fallthrough
CT: control target
= control target key end

     0   :  { %8 = vsyncpa [#allocation4], 0  ;;  %s1962_s0 = inlined_call_operand.hbm [shape: bf16[2,1024], index: 0, kind: input, shape index: {}]   ;;  %s1963_s1 = inlined_call_operand.hbm [shape: bf16[1024,128], index: 1, kind: input, shape index: {}]   ;;  %s1964_s2 = inlined_call_operand.vmem [shape: f32[1,128], index: 2, kind: input, shape index: {}]   ;;  %s1965_s3 = inlined_call_operand.hbm [shape: f32[2,128], index: 3, kind: output, shape index: {}]  }
   0x1   :  { %10 = vsyncpa [#allocation4 + $0x1], 0 }
   0x2   :  { %11 = vsyncpa [#allocation7], 0 }
   0x3   :  { %13 = vsyncpa [#allocation7 + $0x1], 0 }
   0x4   :  { %14 = vsyncpa [#allocation5], 0  ;;  %s1494_s12 = smov 0   ;;  %s1496_s13 = smov 0  }
   0x5   :  { %s1498_s14 = smov 0   ;;  %s1500_s15 = smov 0  }
   0x6   :  { %s1502_s16 = smov 0   ;;  %s1504_s17 = smov 0  }
   0x7 LB: > { %s1057_s18 = sadd.s32 4294967295, %s1463_s17   ;;  %s29_s19 = sadd.s32 1, %s1459_s16  ;;  %s1463_s17 = sphi %s1504_s17, %s20_s17   ;;  %s1459_s16 = sphi %s1502_s16, %s1979_s16   ;;  %s1455_s15 = sphi %s1500_s15, %s1978_s15   ;;  %s1451_s14 = sphi %s1498_s14, %s1977_s14   ;;  %s1447_s13 = sphi %s1496_s13, %s1976_s13   ;;  %s1443_s12 = sphi %s1494_s12, %s1975_s12  }
   0x8   : > { %p30_p0 = scmp.ge.s32.totalorder %s29_s19, 2  ;;  %s41_s20 = sadd.s32 1, %s1451_s14 }
   0x9   : > { %p48_p1 = scmp.ne.s32.totalorder %s1451_s14, %s1447_s13  ;;  %p49_p2 = scmp.eq.s32.totalorder %s1463_s17, 0 }
   0xa   : > { %s1981_s19 = smov (%p30_p0, %s29_s19), 0  ;;  %p54_p4 = scmp.ne.s32.totalorder %s1447_s13, %s1443_s12 }
   0xb   : > { %p1530_p3 = por %p49_p2, %p48_p1  ;;  %s37_s22 = ssub.s32 %s1459_s16, %s1981_s19 }
   0xc   : > { %p55_p5 = scmp.eq.s32.totalorder %s1057_s18, 0  ;;  %p39_p6 = scmp.eq.s32.totalorder %s37_s22, 0 }
   0xd   : > { %p1223_p8 = scmp.lt.s32.totalorder %s1463_s17, 2  ;;  %s1548_s25 = sand.u32 1, %s1451_s14  }
   0xe   : > { %p1539_p7 = por %p55_p5, %p54_p4  ;;  %s1110_s26 = sshll.u32 %s1459_s16, 6 }
   0xf   : > { %s1545_s24 = scalar_select %p39_p6, %s1451_s14, %s41_s20  }
  0x10   : > { %s1060_s27 = sshll.u32 %s1548_s25, 2  ;;  %s166_s30 = scalar_lea.hbm %s1962_s0, %s1110_s26 }
  0x11   : > { %s158_s4 = scalar_lea.vmem [#allocation3], %s1060_s27  ;;  %p1557_p9 = pnand %p1223_p8, %p1530_p3 }
  0x12   : > { %s168_s5 = sshll.u32 %s158_s4, 4  ;;  %p1066_p10 = scmp.ge.s32.totalorder %s1463_s17, 1  ;;  %s169_s5 = int_to_ptr.vmem [resolvable:$true] %s168_s5 }
  0x13   : > { %p194_p11 = scmp.lt.s32.totalorder %s1463_s17, 3  ;;  %s155_s7 = scalar_lea.sflag [#allocation4], %s1548_s25 }
  0x14   : > { %p1327_p12 = pneg %p1557_p9  ;;  %s1338_s8 = scalar_lea.vmem %s169_s5, 64 }
  0x15   : > { %p1339_p13 = scmp.ne.s32.totalorder %s169_s5, %s1338_s8  ;;  %s1465_s9 = smov [#allocation3]  }
  0x16   : > { %s1343_s10 = sshll.u32 %s1465_s9, 4  ;;  %s1344_s10 = int_to_ptr.vmem [resolvable:$false] %s1343_s10 }
  0x17   : > { %p1341_p0 = pnand %p1339_p13, %p1327_p12  ;;  %s1345_s11 = scalar_lea.vmem %s1344_s10, 128 }
  0x18   : > { %p1346_p2 = scmp.lt.s32.totalorder %s169_s5, %s1344_s10  ;;  %p1347_p3 = scmp.lt.s32.totalorder %s1345_s11, %s1338_s8 }
  0x19   : > { %p1342_p1 = pneg %p1341_p0 }
  0x1a   : > { %p1348_p4 = por %p1347_p3, %p1346_p2 }
  0x1c   : > { %p1349_p5 = pnand %p1348_p4, %p1342_p1 }
  0x1e   : > { %1352 = shalt.err (!%p1349_p5)
}
  0x1f   : > { %1219 = dma.hbm_to_vmem [thread:$0]  (!%p1557_p9), %s166_s30, 64, %s169_s5, %s155_s7  }
  0x20   : > { %p1575_p6 = pnand %p1066_p10, %p194_p11  ;;  %s1063_s20 = sshll.u32 %s1548_s25, 8 }
  0x21   : > { %s1111_s21 = sshll.u32 %s1459_s16, 12  ;;  %s179_s28 = scalar_lea.vmem [#allocation6], %s1063_s20 }
  0x22   : > { %s185_s27 = scalar_lea.hbm %s1963_s1, %s1111_s21  ;;  %s186_s29 = sshll.u32 %s179_s28, 4  ;;  %s187_s29 = int_to_ptr.vmem [resolvable:$true] %s186_s29 }
  0x23   : > { %s176_s4 = scalar_lea.sflag [#allocation7], %s1548_s25  ;;  %s1366_s8 = scalar_lea.vmem %s187_s29, 4096 }
  0x24   : > { %p1367_p8 = scmp.ne.s32.totalorder %s187_s29, %s1366_s8  ;;  %s1466_s30 = smov [#allocation6]  }
  0x25   : > { %s1371_s5 = sshll.u32 %s1466_s30, 4  ;;  %s1372_s5 = int_to_ptr.vmem [resolvable:$false] %s1371_s5 }
  0x26   : > { %p1369_p13 = pnand %p1367_p8, %p1327_p12  ;;  %s1373_s7 = scalar_lea.vmem %s1372_s5, 8192 }
  0x27   : > { %p1374_p10 = scmp.lt.s32.totalorder %s187_s29, %s1372_s5  ;;  %p1375_p11 = scmp.lt.s32.totalorder %s1373_s7, %s1366_s8 }
  0x28   : > { %p1370_p0 = pneg %p1369_p13 }
  0x29   : > { %p1376_p1 = por %p1375_p11, %p1374_p10 }
  0x2b   : > { %p1377_p2 = pnand %p1376_p1, %p1370_p0 }
  0x2d   : > { %1380 = shalt.err (!%p1377_p2)
}
  0x2e   : > { %s1467_s9 = smov 64   ;;  %s1468_s10 = smov 4  }
  0x2f   : > { %1222 = dma.hbm_to_vmem [thread:$0]  (!%p1557_p9), %s185_s27, 4096, %s187_s29, %s176_s4, %s1467_s9, %s1467_s9, %s1468_s10  }
  0x30   : > { %198 = sbr.rel (%p1575_p6) target bundleno = 843 (0x34b), region = 32  ;;  %s200_s25 = sand.u32 (!%p1575_p6), 1, %s1447_s13  }
  0x31   : > { %s1067_s11 = sshll.u32 (!%p1575_p6), %s200_s25, 2  ;;  %s201_s20 = scalar_lea.sflag (!%p1575_p6), [#allocation4], %s200_s25 }
  0x32   : > { %s1593_s21 = scalar_lea.vmem (!%p1575_p6), [#allocation3], %s1067_s11 }
  0x35   : > { %1430 = dma.done.wait (%p1539_p7), %s201_s20, 64  }
  0x36   : > { %1432 = vsyncadd (%p1539_p7), %s201_s20, 4294967232  ;;  %s1068_s22 = sshll.u32 %s200_s25, 8  ;;  %s210_s26 = scalar_lea.sflag [#allocation7], %s200_s25 }
  0x37   : > { %s1599_s6 = scalar_lea.vmem [#allocation6], %s1068_s22 }
  0x38   : > { %1434 = dma.done.wait (%p1539_p7), %s210_s26, 4096  }
  0x39   : > { %1436 = vsyncadd (%p1539_p7), %s210_s26, 4294963200  ;;  %p1069_p9 = scmp.ne.s32.totalorder %s1455_s15, 0 }
  0x3b   : > { %242 = sbr.rel (%p1069_p9) target bundleno = 66 (0x42), region = 44 }
  0x40   : > { %v1070_v0 = vld [vmem:[%s1964_s2] ss:$0 sm:$0xff] }
  0x41   : > { %250 = vst [vmem:[#allocation2] sm:$0x3] %v1070_v0 }
  0x42 PF: > { %v1281_v1 = vld [vmem:[%s1599_s6 + $0x78] sm:$0xff]   ;;  %v1285_v5 = vld [vmem:[%s1599_s6 + $0x70] sm:$0xff]   ;;  %v1289_v9 = vld [vmem:[%s1599_s6 + $0x68] sm:$0xff]   ;;  %v329_v31 = vlaneseq  ;;  %v1469_v35 = vmov 1966171168   ;;  %p1104_p7 = scmp.ne.s32.totalorder %s1455_s15, 1 }
  0x43   : > { %v1282_v2 = vld [vmem:[%s1599_s6 + $0xf8] sm:$0xff]   ;;  %1112 = vmatprep.subr.bf16.mxu0 %v1281_v1  ;;  %v1286_v6 = vld [vmem:[%s1599_s6 + $0xf0] sm:$0xff]   ;;  %v1290_v10 = vld [vmem:[%s1599_s6 + $0xe8] sm:$0xff]   ;;  %v327_v36 = vunpack.c.l.s4 %v1469_v35 }
  0x44   : > { %v1283_v3 = vld [vmem:[%s1599_s6 + $0x38] sm:$0xff]   ;;  %1134 = vmatprep.subr.bf16.mxu1 %v1282_v2  ;;  %v1287_v7 = vld [vmem:[%s1599_s6 + $0x30] sm:$0xff]   ;;  %v1291_v11 = vld [vmem:[%s1599_s6 + $0x28] sm:$0xff]   ;;  %v1642_v37 = vshrl.u32 %v329_v31, 7 }
  0x45   : > { %v1284_v4 = vld [vmem:[%s1599_s6 + $0xb8] sm:$0xff]   ;;  %1113 = vmatpush3.bf16.msra.mxu0 %v1283_v3  ;;  %v1288_v8 = vld [vmem:[%s1599_s6 + $0xb0] sm:$0xff]   ;;  %v1292_v12 = vld [vmem:[%s1599_s6 + $0xa8] sm:$0xff]   ;;  %v328_v39 = vunpack.c.0.s8 %v327_v36 }
  0x46   : > { %1135 = vmatpush3.bf16.msra.mxu1 %v1284_v4  ;;  %1114 = vmatprep.subr.bf16.mxu0 %v1285_v5  ;;  %v1293_v13 = vld [vmem:[%s1599_s6 + $0x60] sm:$0xff]   ;;  %v1297_v17 = vld [vmem:[%s1599_s6 + $0x58] sm:$0xff]   ;;  %v1301_v21 = vld [vmem:[%s1599_s6 + $0x50] sm:$0xff]  }
  0x47   : > { %1136 = vmatprep.subr.bf16.mxu1 %v1286_v6  ;;  %v1294_v14 = vld [vmem:[%s1599_s6 + $0xe0] sm:$0xff]   ;;  %v1298_v18 = vld [vmem:[%s1599_s6 + $0xd8] sm:$0xff]   ;;  %v1302_v22 = vld [vmem:[%s1599_s6 + $0xd0] sm:$0xff]   ;;  %v331_v40 = vsub.s32 %v328_v39, %v1642_v37 }
  0x48   : > { %v1295_v15 = vld [vmem:[%s1599_s6 + $0x20] sm:$0xff]   ;;  %v1299_v19 = vld [vmem:[%s1599_s6 + $0x18] sm:$0xff]   ;;  %v1303_v23 = vld [vmem:[%s1599_s6 + $0x10] sm:$0xff]  }
  0x49   : > { %1115 = vmatpush3.bf16.msra.mxu0 %v1287_v7  ;;  %v1296_v16 = vld [vmem:[%s1599_s6 + $0xa0] sm:$0xff]   ;;  %v1300_v20 = vld [vmem:[%s1599_s6 + $0x98] sm:$0xff]   ;;  %v1304_v24 = vld [vmem:[%s1599_s6 + $0x90] sm:$0xff]  }
  0x4a   : > { %1137 = vmatpush3.bf16.msra.mxu1 %v1288_v8  ;;  %1116 = vmatprep.subr.bf16.mxu0 %v1289_v9  ;;  %v1305_v25 = vld [vmem:[%s1599_s6 + $0x48] sm:$0xff]   ;;  %v1309_v29 = vld [vmem:[%s1599_s6 + $0x40] sm:$0xff]   ;;  %v1071_v34 = vld.sshfl [vmem:[%s1593_s21] sm:$0x33 pattern:$0x75316420] }
  0x4b   : > { %1138 = vmatprep.subr.bf16.mxu1 %v1290_v10  ;;  %v1306_v26 = vld [vmem:[%s1599_s6 + $0xc8] sm:$0xff]   ;;  %v1310_v30 = vld [vmem:[%s1599_s6 + $0xc0] sm:$0xff]   ;;  %v325_v38 = vcombine.high %v1071_v34, %v1071_v34  ;;  %v332_v42 = vrot.slane %v1071_v34, %v331_v40  ;;  %v251_v52 = vld [vmem:[#allocation2] sm:$0x3] }
  0x4c   : > { %v1307_v27 = vld [vmem:[%s1599_s6 + $0x8] sm:$0xff]   ;;  %v1311_v32 = vld [vmem:[%s1599_s6] sm:$0xff]  }
  0x4d   : > { %1117 = vmatpush3.bf16.msra.mxu0 %v1291_v11  ;;  %v1308_v28 = vld [vmem:[%s1599_s6 + $0x88] sm:$0xff]   ;;  %v1312_v33 = vld [vmem:[%s1599_s6 + $0x80] sm:$0xff]   ;;  %v339_v41 = vrot.slane %v325_v38, %v331_v40  ;;  %v340_v44 = vcombine.high %v332_v42, %v332_v42 }
  0x4e   : > { %1139 = vmatpush3.bf16.msra.mxu1 %v1292_v12  ;;  %1118 = vmatprep.subr.bf16.mxu0 %v1293_v13 }
  0x4f   : > { %1140 = vmatprep.subr.bf16.mxu1 %v1294_v14  ;;  %570 = vmatprep.mubr.bf16.mxu0 %v339_v41  ;;  %v341_v43 = vcombine.high %v339_v41, %v339_v41 }
  0x51   : > { %1119 = vmatpush3.bf16.msra.mxu0 %v1295_v15  ;;  %610 = vmatprep.mubr.bf16.mxu1 %v341_v43 }
  0x52   : > { %1141 = vmatpush3.bf16.msra.mxu1 %v1296_v16  ;;  %1120 = vmatprep.subr.bf16.mxu0 %v1297_v17 }
  0x53   : > { %1142 = vmatprep.subr.bf16.mxu1 %v1298_v18 }
  0x55   : > { %1121 = vmatpush3.bf16.msra.mxu0 %v1299_v19 }
  0x56   : > { %1143 = vmatpush3.bf16.msra.mxu1 %v1300_v20  ;;  %1122 = vmatprep.subr.bf16.mxu0 %v1301_v21 }
  0x57   : > { %1144 = vmatprep.subr.bf16.mxu1 %v1302_v22 }
  0x59   : > { %1123 = vmatpush3.bf16.msra.mxu0 %v1303_v23 }
  0x5a   : > { %1145 = vmatpush3.bf16.msra.mxu1 %v1304_v24  ;;  %1124 = vmatprep.subr.bf16.mxu0 %v1305_v25 }
  0x5b   : > { %1146 = vmatprep.subr.bf16.mxu1 %v1306_v26 }
  0x5d   : > { %1125 = vmatpush3.bf16.msra.mxu0 %v1307_v27 }
  0x5e   : > { %1147 = vmatpush3.bf16.msra.mxu1 %v1308_v28  ;;  %1126 = vmatprep.subr.bf16.mxu0 %v1309_v29 }
  0x5f   : > { %1148 = vmatprep.subr.bf16.mxu1 %v1310_v30 }
  0x61   : > { %1127 = vmatpush3.bf16.msra.mxu0 %v1311_v32 }
  0x62   : > { %1149 = vmatpush3.bf16.msra.mxu1 %v1312_v33 }
  0x64   : > { %571 = vmatmul.mubr.bf16.vlgmr.msra.gmra.mxu0 %v332_v42 }
  0x65   : > { %611 = vmatmul.mubr.bf16.vlgmr.msra.gmra.mxu1 %v340_v44 }
 0x124   : > { %v1128_v45 = vpop.f32.mrf.mxu0 }
 0x125   : > { %v1150_v46 = vpop.f32.mrf.mxu1 }
 0x126   : > { %v1129_v47 = vpop.f32.mrf.mxu0 }
 0x127   : > { %v1130_v48 = vadd.f32 %v1129_v47, %v1128_v45  ;;  %v1151_v49 = vpop.f32.mrf.mxu1 }
 0x128   : > { %v1131_v50 = vpop.f32.mrf.mxu0  ;;  %v1152_v51 = vadd.f32 %v1151_v49, %v1150_v46 }
 0x129   : > { %v1153_v53 = vpop.f32.mrf.mxu1 }
 0x12a   : > { %v1132_v54 = vpop.f32.mrf.mxu0  ;;  %v613_v55 = vadd.f32 %v1152_v51, %v1130_v48  ;;  %623 = sbr.rel (%p1104_p7) target bundleno = 828 (0x33c), region = 48 }
 0x12b   : > { %v1154_v56 = vpop.f32.mrf.mxu1 }
 0x12c   : > { %v618_v57 = vadd.f32 %v613_v55, %v251_v52 }
 0x12e   : > { %619 = vst [vmem:[#allocation2] sm:$0x3] %v618_v57 }
 0x12f   : > { %v1646_v59 = vand.u32 127, %v329_v31  ;;  %vm631_vm0 = vcmask 1041408   ;;  %v695_v4 = vadd.s32 120, %v1642_v37  ;;  %v1470_v7 = vmov 0.0  }
 0x130   : > { %1173 = vmatprep.subr.mxu0 %v1470_v7  ;;  %v694_v8 = vadd.s32 112, %v1642_v37  ;;  %v693_v9 = vadd.s32 104, %v1642_v37  ;;  %v692_v12 = vadd.s32 96, %v1642_v37  ;;  %v691_v49 = vadd.s32 88, %v1642_v37 }
 0x131   : > { %vm628_vm1 = vcmp.lt.s32.totalorder %v1646_v59, 10  ;;  %vm662_vm2 = vcmp.ge.s32.totalorder %v1646_v59, 20  ;;  %vm663_vm3 = vcmp.lt.s32.totalorder %v1646_v59, 30  ;;  %vm645_vm4 = vcmp.ge.s32.totalorder %v1646_v59, 10 }
 0x132   : > { %vm1656_vm5 = vmand %vm662_vm2, %vm663_vm3  ;;  %vm646_vm6 = vcmp.lt.s32.totalorder %v1646_v59, 20  ;;  %v1681_v5 = vadd.s32 10, %v1646_v59  ;;  %v1684_v6 = vadd.s32 20, %v1646_v59  ;;  %vm711_vm8 = vcmp.eq.s32.totalorder %v695_v4, %v1646_v59 }
 0x133   : > { %vm1667_vm7 = vmand %vm645_vm4, %vm646_vm6  ;;  %vm710_vm12 = vcmp.eq.s32.totalorder %v694_v8, %v1646_v59  ;;  %vm709_vm4 = vcmp.eq.s32.totalorder %v693_v9, %v1646_v59  ;;  %v690_v51 = vadd.s32 80, %v1642_v37  ;;  %v689_v54 = vadd.s32 72, %v1642_v37 }
 0x134   : > { %vm776_vm9 = vcmp.eq.s32.totalorder %v695_v4, %v1681_v5  ;;  %vm841_vm10 = vcmp.eq.s32.totalorder %v695_v4, %v1684_v6  ;;  %vm727_vm11 = vmand %vm711_vm8, %vm628_vm1  ;;  %vm775_vm14 = vcmp.eq.s32.totalorder %v694_v8, %v1681_v5  ;;  %vm840_vm2 = vcmp.eq.s32.totalorder %v694_v8, %v1684_v6 }
 0x135   : > { %v624_v58 = vld [vmem:[#allocation2] sm:$0x3]  ;;  %v743_v10 = vsel %vm727_vm11, 0.33333334, %v1470_v7  ;;  %vm792_vm13 = vmand %vm776_vm9, %vm628_vm1  ;;  %vm774_vm8 = vcmp.eq.s32.totalorder %v693_v9, %v1681_v5  ;;  %v686_v4 = vadd.s32 48, %v1642_v37 }
 0x136   : > { %v1654_v60 = vsel %vm628_vm1, %v624_v58, -1e+30  ;;  %v1665_v63 = vsel %vm1656_vm5, %v624_v58, -1e+30  ;;  %v1675_v2 = vsel %vm1667_vm7, %v624_v58, -1e+30  ;;  %vm857_vm15 = vmand %vm841_vm10, %vm628_vm1  ;;  %vm839_vm10 = vcmp.eq.s32.totalorder %v693_v9, %v1684_v6 }
 0x137   : > { %v632_v62 = vsel %vm631_vm0, %v1654_v60, -inf  ;;  %v666_v1 = vsel %vm631_vm0, %v1665_v63, -inf  ;;  %v649_v3 = vsel %vm631_vm0, %v1675_v2, -inf  ;;  %v808_v11 = vsel %vm792_vm13, 0.33333334, %v1470_v7  ;;  %vm726_vm3 = vmand %vm710_vm12, %vm628_vm1 }
 0x138   : > { %633 = vmax.xlane.f32.xlu0 %v632_v62  ;;  %667 = vmax.xlane.f32.xlu1 %v666_v1  ;;  %v824_v13 = vadd.f32 %v808_v11, %v743_v10  ;;  %v873_v14 = vsel %vm857_vm15, 0.33333334, %v1470_v7  ;;  %v742_v15 = vsel %vm726_vm3, 0.33333334, %v1470_v7  ;;  %vm791_vm6 = vmand %vm775_vm14, %vm628_vm1  ;;  %vm708_vm12 = vcmp.eq.s32.totalorder %v692_v12, %v1646_v59 }
 0x139   : > { %v807_v17 = vsel %vm791_vm6, 0.33333334, %v1470_v7  ;;  %vm856_vm9 = vmand %vm840_vm2, %vm628_vm1  ;;  %vm773_vm14 = vcmp.eq.s32.totalorder %v692_v12, %v1681_v5  ;;  %vm838_vm2 = vcmp.eq.s32.totalorder %v692_v12, %v1684_v6  ;;  %v688_v58 = vadd.s32 64, %v1642_v37 }
 0x13a   : > { %v889_v16 = vadd.f32 %v873_v14, %v824_v13  ;;  %v823_v18 = vadd.f32 %v807_v17, %v742_v15  ;;  %v872_v19 = vsel %vm856_vm9, 0.33333334, %v1470_v7  ;;  %vm725_vm11 = vmand %vm709_vm4, %vm628_vm1  ;;  %v687_v1 = vadd.s32 56, %v1642_v37 }
 0x13b   : > { %v741_v20 = vsel %vm725_vm11, 0.33333334, %v1470_v7  ;;  %vm790_vm13 = vmand %vm774_vm8, %vm628_vm1  ;;  %vm707_vm8 = vcmp.eq.s32.totalorder %v691_v49, %v1646_v59  ;;  %vm771_vm11 = vcmp.eq.s32.totalorder %v690_v51, %v1681_v5  ;;  %v685_v13 = vadd.s32 40, %v1642_v37 }
 0x13c   : > { %650 = vmax.xlane.f32.xlu0 %v649_v3  ;;  %1174 = vmatpush3.msra.mxu0 %v889_v16  ;;  %v888_v21 = vadd.f32 %v872_v19, %v823_v18  ;;  %v806_v22 = vsel %vm790_vm13, 0.33333334, %v1470_v7  ;;  %vm855_vm15 = vmand %vm839_vm10, %vm628_vm1  ;;  %vm837_vm10 = vcmp.eq.s32.totalorder %v691_v49, %v1684_v6  ;;  %v684_v19 = vadd.s32 32, %v1642_v37 }
 0x13d   : > { %1175 = vmatprep.subr.mxu0 %v1470_v7  ;;  %v822_v23 = vadd.f32 %v806_v22, %v741_v20  ;;  %v871_v24 = vsel %vm855_vm15, 0.33333334, %v1470_v7  ;;  %vm724_vm3 = vmand %vm708_vm12, %vm628_vm1 }
 0x13e   : > { %1176 = vmatpush3.msra.mxu0 %v888_v21  ;;  %v740_v25 = vsel %vm724_vm3, 0.33333334, %v1470_v7  ;;  %vm789_vm4 = vmand %vm773_vm14, %vm628_vm1  ;;  %vm836_vm14 = vcmp.eq.s32.totalorder %v690_v51, %v1684_v6  ;;  %vm770_vm3 = vcmp.eq.s32.totalorder %v689_v54, %v1681_v5 }
 0x13f   : > { %1177 = vmatprep.subr.mxu0 %v1470_v7  ;;  %v887_v26 = vadd.f32 %v871_v24, %v822_v23  ;;  %v805_v27 = vsel %vm789_vm4, 0.33333334, %v1470_v7  ;;  %vm854_vm6 = vmand %vm838_vm2, %vm628_vm1  ;;  %vm705_vm2 = vcmp.eq.s32.totalorder %v689_v54, %v1646_v59 }
 0x140   : > { %v821_v28 = vadd.f32 %v805_v27, %v740_v25  ;;  %v870_v29 = vsel %vm854_vm6, 0.33333334, %v1470_v7  ;;  %vm723_vm9 = vmand %vm707_vm8, %vm628_vm1  ;;  %vm835_vm8 = vcmp.eq.s32.totalorder %v689_v54, %v1684_v6  ;;  %v683_v25 = vadd.s32 24, %v1642_v37 }
 0x141   : > { %1178 = vmatpush3.msra.mxu0 %v887_v26  ;;  %v739_v52 = vsel %vm723_vm9, 0.33333334, %v1470_v7  ;;  %vm853_vm12 = vmand %vm837_vm10, %vm628_vm1 }
 0x142   : > { %1179 = vmatprep.subr.mxu0 %v1470_v7  ;;  %v886_v30 = vadd.f32 %v870_v29, %v821_v28  ;;  %v869_v56 = vsel %vm853_vm12, 0.33333334, %v1470_v7  ;;  %vm787_vm15 = vmand %vm771_vm11, %vm628_vm1  ;;  %vm703_vm12 = vcmp.eq.s32.totalorder %v687_v1, %v1646_v59 }
 0x143   : > { %v803_v61 = vsel %vm787_vm15, 0.33333334, %v1470_v7  ;;  %vm852_vm4 = vmand %vm836_vm14, %vm628_vm1  ;;  %vm768_vm14 = vcmp.eq.s32.totalorder %v687_v1, %v1681_v5 }
 0x144   : > { %1180 = vmatpush3.msra.mxu0 %v886_v30  ;;  %vm721_vm6 = vmand %vm705_vm2, %vm628_vm1  ;;  %vm833_vm2 = vcmp.eq.s32.totalorder %v687_v1, %v1684_v6 }
 0x145   : > { %1181 = vmatprep.subr.mxu0 %v1470_v7  ;;  %v737_v0 = vsel %vm721_vm6, 0.33333334, %v1470_v7  ;;  %vm786_vm9 = vmand %vm770_vm3, %vm628_vm1 }
 0x146   : > { %v802_v3 = vsel %vm786_vm9, 0.33333334, %v1470_v7  ;;  %vm851_vm10 = vmand %vm835_vm8, %vm628_vm1  ;;  %vm767_vm8 = vcmp.eq.s32.totalorder %v686_v4, %v1681_v5  ;;  %vm832_vm9 = vcmp.eq.s32.totalorder %v686_v4, %v1684_v6 }
 0x147   : > { %v818_v8 = vadd.f32 %v802_v3, %v737_v0  ;;  %v867_v9 = vsel %vm851_vm10, 0.33333334, %v1470_v7  ;;  %vm719_vm3 = vmand %vm703_vm12, %vm628_vm1  ;;  %vm701_vm10 = vcmp.eq.s32.totalorder %v685_v13, %v1646_v59 }
 0x148   : > { %v735_v16 = vsel %vm719_vm3, 0.33333334, %v1470_v7  ;;  %vm784_vm6 = vmand %vm768_vm14, %vm628_vm1  ;;  %vm765_vm3 = vcmp.eq.s32.totalorder %v684_v19, %v1681_v5 }
 0x149   : > { %v883_v11 = vadd.f32 %v867_v9, %v818_v8  ;;  %v800_v18 = vsel %vm784_vm6, 0.33333334, %v1470_v7  ;;  %vm848_vm12 = vmand %vm832_vm9, %vm628_vm1  ;;  %vm1471_vm9 = vmmov 0  }
 0x14a   : > { %v816_v20 = vadd.f32 %v800_v18, %v735_v16  ;;  %v864_v27 = vsel %vm848_vm12, 0.33333334, %v1470_v7  ;;  %vm717_vm14 = vmand %vm701_vm10, %vm628_vm1  ;;  %1205 = vmatprep.mubr.msk.f32.mxu0 %vm1471_vm9, %v1470_v7  ;;  %vm764_vm10 = vcmp.eq.s32.totalorder %v683_v25, %v1681_v5 }
 0x14b   : > { %v733_v28 = vsel %vm717_vm14, 0.33333334, %v1470_v7  ;;  %vm780_vm14 = vmand %vm764_vm10, %vm628_vm1 }
 0x1c1   : > { %v634_v31 = vpop.xlane.xlu0 %633  ;;  %v668_v33 = vpop.xlane.xlu1 %667 }
 0x1c2   : > { %v635_v32 = vsub.f32 %v1654_v60, %v634_v31  ;;  %v669_v34 = vsub.f32 %v1665_v63, %v668_v33  ;;  %v868_v63 = vsel %vm852_vm4, 0.33333334, %v1470_v7  ;;  %vm702_vm4 = vcmp.eq.s32.totalorder %v686_v4, %v1646_v59 }
 0x1c3   : > { %v682_v31 = vadd.s32 16, %v1642_v37 }
 0x1c4   : > { %v636_v35 = vmul.f32 1.442695, %v635_v32  ;;  %v670_v36 = vmul.f32 1.442695, %v669_v34 }
 0x1c5   : > { %v651_v38 = vpop.xlane.xlu0 %650 }
 0x1c6   : > { %1313 = vpow2.f32 %v636_v35  ;;  %v652_v39 = vsub.f32 %v1675_v2, %v651_v38  ;;  %v681_v38 = vadd.s32 8, %v1642_v37 }
 0x1c7   : > { %1315 = vpow2.f32 %v670_v36 }
 0x1c8   : > { %v653_v40 = vmul.f32 1.442695, %v652_v39 }
 0x1ca   : > { %1317 = vpow2.f32 %v653_v40 }
 0x1d3   : > { %v1314_v41 = vpop.eup %1313 }
 0x1d4   : > { %v1316_v42 = vpop.eup %1315  ;;  %v1747_v43 = vsel %vm628_vm1, %v1314_v41, 0.0 }
 0x1d5   : > { %v639_v44 = vsel %vm631_vm0, %v1747_v43, 0.0  ;;  %v1753_v45 = vsel %vm1656_vm5, %v1316_v42, 0.0  ;;  %vm772_vm5 = vcmp.eq.s32.totalorder %v691_v49, %v1681_v5 }
 0x1d6   : > { %640 = vadd.xlane.f32.xlu1 %v639_v44  ;;  %v673_v47 = vsel %vm631_vm0, %v1753_v45, 0.0  ;;  %v796_v44 = vsel %vm780_vm14, 0.33333334, %v1470_v7 }
 0x1d7   : > { %v1318_v46 = vpop.eup %1317 }
 0x1d8   : > { %v1759_v48 = vsel %vm1667_vm7, %v1318_v46, 0.0  ;;  %vm788_vm7 = vmand %vm772_vm5, %vm628_vm1  ;;  %vm704_vm5 = vcmp.eq.s32.totalorder %v688_v58, %v1646_v59 }
 0x1d9   : > { %v656_v50 = vsel %vm631_vm0, %v1759_v48, 0.0  ;;  %vm706_vm0 = vcmp.eq.s32.totalorder %v690_v51, %v1646_v59  ;;  %v804_v53 = vsel %vm788_vm7, 0.33333334, %v1470_v7  ;;  %vm769_vm7 = vcmp.eq.s32.totalorder %v688_v58, %v1681_v5  ;;  %vm720_vm11 = vmand %vm704_vm5, %vm628_vm1 }
 0x1da   : > { %674 = vadd.xlane.f32.xlu1 %v673_v47  ;;  %657 = vadd.xlane.f32.xlu0 %v656_v50  ;;  %v820_v55 = vadd.f32 %v804_v53, %v739_v52  ;;  %vm722_vm13 = vmand %vm706_vm0, %vm628_vm1  ;;  %vm834_vm0 = vcmp.eq.s32.totalorder %v688_v58, %v1684_v6  ;;  %v736_v10 = vsel %vm720_vm11, 0.33333334, %v1470_v7  ;;  %vm766_vm11 = vcmp.eq.s32.totalorder %v685_v13, %v1681_v5 }
 0x1db   : > { %v738_v57 = vsel %vm722_vm13, 0.33333334, %v1470_v7  ;;  %vm785_vm13 = vmand %vm769_vm7, %vm628_vm1 }
 0x1dc   : > { %v885_v60 = vadd.f32 %v869_v56, %v820_v55  ;;  %v819_v62 = vadd.f32 %v803_v61, %v738_v57  ;;  %v801_v12 = vsel %vm785_vm13, 0.33333334, %v1470_v7  ;;  %vm850_vm15 = vmand %vm834_vm0, %vm628_vm1  ;;  %vm831_vm13 = vcmp.eq.s32.totalorder %v685_v13, %v1684_v6 }
 0x1dd   : > { %v817_v14 = vadd.f32 %v801_v12, %v736_v10  ;;  %v866_v15 = vsel %vm850_vm15, 0.33333334, %v1470_v7  ;;  %vm849_vm5 = vmand %vm833_vm2, %vm628_vm1  ;;  %vm700_vm15 = vcmp.eq.s32.totalorder %v684_v19, %v1646_v59  ;;  %v1472_v56 = vmov 0.33333334  }
 0x1de   : > { %1182 = vmatpush3.msra.mxu0 %v885_v60  ;;  %v884_v2 = vadd.f32 %v868_v63, %v819_v62  ;;  %v865_v21 = vsel %vm849_vm5, 0.33333334, %v1470_v7  ;;  %vm718_vm7 = vmand %vm702_vm4, %vm628_vm1  ;;  %vm830_vm4 = vcmp.eq.s32.totalorder %v684_v19, %v1684_v6  ;;  %vm699_vm5 = vcmp.eq.s32.totalorder %v683_v25, %v1646_v59 }
 0x1df   : > { %1183 = vmatprep.subr.mxu0 %v1470_v7  ;;  %v882_v17 = vadd.f32 %v866_v15, %v817_v14  ;;  %v734_v22 = vsel %vm718_vm7, 0.33333334, %v1470_v7  ;;  %vm783_vm0 = vmand %vm767_vm8, %vm628_vm1  ;;  %v881_v23 = vadd.f32 %v865_v21, %v816_v20 }
 0x1e0   : > { %1184 = vmatpush3.msra.mxu0 %v884_v2  ;;  %v799_v24 = vsel %vm783_vm0, 0.33333334, %v1470_v7  ;;  %vm782_vm2 = vmand %vm766_vm11, %vm628_vm1  ;;  %vm829_vm11 = vcmp.eq.s32.totalorder %v683_v25, %v1684_v6 }
 0x1e1   : > { %1185 = vmatprep.subr.mxu0 %v1470_v7  ;;  %v815_v26 = vadd.f32 %v799_v24, %v734_v22  ;;  %v798_v30 = vsel %vm782_vm2, 0.33333334, %v1470_v7  ;;  %vm847_vm6 = vmand %vm831_vm13, %vm628_vm1  ;;  %vm698_vm13 = vcmp.eq.s32.totalorder %v682_v31, %v1646_v59 }
 0x1e2   : > { %1186 = vmatpush3.msra.mxu0 %v883_v11  ;;  %v814_v32 = vadd.f32 %v798_v30, %v733_v28  ;;  %v863_v33 = vsel %vm847_vm6, 0.33333334, %v1470_v7  ;;  %vm716_vm8 = vmand %vm700_vm15, %vm628_vm1  ;;  %vm763_vm15 = vcmp.eq.s32.totalorder %v682_v31, %v1681_v5  ;;  %vm697_vm6 = vcmp.eq.s32.totalorder %v681_v38, %v1646_v59 }
 0x1e3   : > { %1187 = vmatprep.subr.mxu0 %v1470_v7  ;;  %v880_v29 = vadd.f32 %v864_v27, %v815_v26  ;;  %v732_v34 = vsel %vm716_vm8, 0.33333334, %v1470_v7  ;;  %vm781_vm7 = vmand %vm765_vm3, %vm628_vm1  ;;  %vm828_vm3 = vcmp.eq.s32.totalorder %v682_v31, %v1684_v6 }
 0x1e4   : > { %1188 = vmatpush3.msra.mxu0 %v882_v17  ;;  %v879_v35 = vadd.f32 %v863_v33, %v814_v32  ;;  %v797_v36 = vsel %vm781_vm7, 0.33333334, %v1470_v7  ;;  %vm846_vm0 = vmand %vm830_vm4, %vm628_vm1 }
 0x1e5   : > { %1189 = vmatprep.subr.mxu0 %v1470_v7  ;;  %v813_v39 = vadd.f32 %v797_v36, %v732_v34  ;;  %v862_v40 = vsel %vm846_vm0, 0.33333334, %v1470_v7  ;;  %vm715_vm12 = vmand %vm699_vm5, %vm628_vm1  ;;  %vm762_vm5 = vcmp.eq.s32.totalorder %v681_v38, %v1681_v5  ;;  %vm696_vm0 = vcmp.eq.s32.totalorder %v1642_v37, %v1646_v59 }
 0x1e6   : > { %1190 = vmatpush3.msra.mxu0 %v881_v23  ;;  %v731_v41 = vsel %vm715_vm12, 0.33333334, %v1470_v7  ;;  %vm845_vm2 = vmand %vm829_vm11, %vm628_vm1 }
 0x1e7   : > { %1191 = vmatprep.subr.mxu0 %v1470_v7  ;;  %v878_v42 = vadd.f32 %v862_v40, %v813_v39  ;;  %v812_v46 = vadd.f32 %v796_v44, %v731_v41  ;;  %v861_v47 = vsel %vm845_vm2, 0.33333334, %v1470_v7  ;;  %vm714_vm4 = vmand %vm698_vm13, %vm628_vm1 }
 0x1e8   : > { %1192 = vmatpush3.msra.mxu0 %v880_v29  ;;  %v730_v49 = vsel %vm714_vm4, 0.33333334, %v1470_v7  ;;  %vm779_vm8 = vmand %vm763_vm15, %vm628_vm1 }
 0x1e9   : > { %1193 = vmatprep.subr.mxu0 %v1470_v7  ;;  %v877_v50 = vadd.f32 %v861_v47, %v812_v46  ;;  %v795_v6 = vsel %vm779_vm8, 0.33333334, %v1470_v7  ;;  %vm844_vm9 = vmand %vm828_vm3, %vm628_vm1 }
 0x1ea   : > { %1194 = vmatpush3.msra.mxu0 %v879_v35  ;;  %v811_v51 = vadd.f32 %v795_v6, %v730_v49  ;;  %v860_v52 = vsel %vm844_vm9, 0.33333334, %v1470_v7  ;;  %vm713_vm7 = vmand %vm697_vm6, %vm628_vm1 }
 0x1eb   : > { %1195 = vmatprep.subr.mxu0 %v1470_v7  ;;  %v729_v53 = vsel %vm713_vm7, 0.33333334, %v1470_v7  ;;  %vm778_vm10 = vmand %vm762_vm5, %vm628_vm1 }
 0x1ec   : > { %1196 = vmatpush3.msra.mxu0 %v878_v42  ;;  %v876_v5 = vadd.f32 %v860_v52, %v811_v51  ;;  %v794_v54 = vsel %vm778_vm10, 0.33333334, %v1470_v7  ;;  %vm712_vm11 = vmand %vm696_vm0, %vm628_vm1 }
 0x1ed   : > { %1197 = vmatprep.subr.mxu0 %v1470_v7  ;;  %v810_v55 = vadd.f32 %v794_v54, %v729_v53 }
 0x1ee   : > { %1198 = vmatpush3.msra.mxu0 %v877_v50 }
 0x1ef   : > { %1199 = vmatprep.subr.mxu0 %v1470_v7 }
 0x1f0   : > { %1200 = vmatpush3.msra.mxu0 %v876_v5 }
 0x1f1   : > { %1201 = vmatprep.subr.mxu0 %v1470_v7 }
 0x1f2   : > { %1202 = vmatpush3.msra.mxu0 %v810_v55 }
 0x1f3   : > { %1203 = vmatprep.subr.mxu0 %v1470_v7 }
 0x1f4   : > { %1204 = vmatpush3.msk.msra.mxu0 %vm712_vm11, %v1472_v56 }
 0x25f   : > { %v641_v57 = vpop.xlane.xlu1 %640 }
 0x260   : > { %1319 = vrcp.f32 %v641_v57 }
 0x263   : > { %v675_v58 = vpop.xlane.xlu1 %674  ;;  %v658_v60 = vpop.xlane.xlu0 %657 }
 0x264   : > { %1321 = vrcp.f32 %v675_v58 }
 0x265   : > { %1323 = vrcp.f32 %v658_v60 }
 0x26d   : > { %v1320_v61 = vpop.eup %1319 }
 0x26e   : > { %v643_v63 = vmul.f32 %v1320_v61, %v1747_v43 }
 0x271   : > { %v1322_v37 = vpop.eup %1321 }
 0x272   : > { %v1324_v62 = vpop.eup %1323  ;;  %v677_v1 = vmul.f32 %v1322_v37, %v1753_v45 }
 0x273   : > { %v660_v0 = vmul.f32 %v1324_v62, %v1759_v48 }
 0x275   : > { %v661_v59 = vadd.f32 %v660_v0, %v643_v63 }
 0x277   : > { %v678_v2 = vadd.f32 %v677_v1, %v661_v59 }
 0x279   : > { %1206 = vmatmul.mubr.f32.vlgmr.msra.gmra.mxu0 %v678_v2 }
 0x339   : > { %v956_v7 = vpop.f32.mrf.mxu0 }
 0x33a   : > { %960 = vst [vmem:[#allocation8] sm:$0x3] %v956_v7 }
 0x33b   : > { %v1207_v3 = vpop.f32.mrf.mxu0 }
 0x33c PF: > { %p1929_p12 = scmp.eq.s32.totalorder %s1057_s18, 1  ;;  %s1473_s23 = smov [#allocation8]  }
 0x33d   : > { %s970_s28 = sshll.u32 %s1473_s23, 4  ;;  %s971_s28 = int_to_ptr.vmem [resolvable:$true] %s970_s28 }
 0x33e   : > { %s1381_s29 = scalar_lea.vmem %s971_s28, 32  ;;  %p1388_p6 = scmp.lt.s32.totalorder %s971_s28, %s971_s28 }
 0x33f   : > { %p1382_p3 = scmp.ne.s32.totalorder %s971_s28, %s1381_s29  ;;  %p1389_p8 = scmp.lt.s32.totalorder %s1381_s29, %s1381_s29 }
 0x341   : > { %p1383_p4 = pnand %p1382_p3, %p1929_p12  ;;  %p1390_p13 = por %p1389_p8, %p1388_p6 }
 0x343   : > { %p1384_p5 = pneg %p1383_p4 }
 0x345   : > { %p1391_p0 = pnand %p1390_p13, %p1384_p5 }
 0x347   : > { %1394 = shalt.err (!%p1391_p0)
}
 0x348   : > { %1213 = dma.vmem_to_hbm [thread:$0]  (%p1929_p12), %s971_s28, 32, %s1965_s3, [#allocation5]  }
 0x349   : > { %1438 = dma.done.wait (%p1929_p12), [#allocation5], 32  }
 0x34a   : > { %1440 = vsyncadd (%p1929_p12), [#allocation5], 4294967264 }
 0x34b PF: > { %s20_s17 = sadd.s32 1, %s1463_s17   ;;  %s1975_s12 = smov %s1447_s13 }
 0x34c   : > { %p17_p10 = scmp.ge.s32.totalorder %s20_s17, 4   ;;  %s1976_s13 = smov %s1451_s14 }
 0x34d   : > { %s1977_s14 = smov %s1545_s24  ;;  %s1978_s15 = smov %s1459_s16 }
 0x34e   : > { %s1979_s16 = smov %s1981_s19  ;;  %19 = sbr.rel (!%p17_p10) target bundleno = 7 (0x7), region = 91 }
 0x353   :  { %983 = vsyncpa [#allocation4], 1 }
 0x354   :  { %985 = vsyncpa [#allocation4 + $0x1], 1 }
 0x355   :  { %986 = vsyncpa [#allocation7], 1 }
 0x356   :  { %988 = vsyncpa [#allocation7 + $0x1], 1 }
 0x357   :  { %989 = vsyncpa [#allocation5], 1 }
 0x358   :  { %991 = vsyncpa [#allocation5 + $0x1], 1 }

</bundles_post_ra>
